<compile_context>
chip_gen: v6e
topology: v6e:2x2x1
jax: 0.10.0
libtpu: 0.0.40
codegen_flags: <defaults>
</compile_context>

<pallas_src>
import functools
import math

import jax
import jax.numpy as jnp
from jax.experimental import pallas as pl
from jax.experimental.pallas import tpu as pltpu


def gate_kernel(h_ref, m_ref, gh_ref, wm_ref, bias_ref, out_ref):
    """One row-tile of the gated update (all arrays lane-dense, last dim % 128 == 0).

    h_ref   : (TM, P)   packed node features   (P  = pack * in_feature)
    m_ref   : (TM, Pm)  packed messages        (Pm = pack * edge_feature)
    gh_ref  : (P,  P)   block-diag gate weight for h (each block = gwh @ ones(1,out))
    wm_ref  : (Pm, 2P)  [block-diag gate weight for msg | block-diag W weight]
    bias_ref: (1,  2P)  [gate bias tiled | W bias tiled]
    out_ref : (TM, P)
    """
    P = out_ref.shape[-1]
    h = h_ref[...].astype(jnp.float32)

    # Single fused matmul for everything contracting against `message`:
    #   columns [0, P)  -> message contribution to the gate logit
    #   columns [P, 2P) -> W(message)
    mres = (
        jnp.dot(m_ref[...], wm_ref[...], preferred_element_type=jnp.float32)
        + bias_ref[...]
    )

    gate = (
        jnp.dot(h_ref[...], gh_ref[...], preferred_element_type=jnp.float32)
        + mres[:, :P]
    )
    coeff = jax.nn.sigmoid(gate)      # per logical row, already broadcast across out lanes
    wmsg = mres[:, P:]

    retval = coeff * h + (1.0 - coeff) * wmsg
    out_ref[...] = (retval * jax.nn.sigmoid(retval)).astype(out_ref.dtype)   # SiLU


def _block_diag(block, p):
    """(r, c) block -> (p*r, p*c) block-diagonal matrix (plain JAX glue)."""
    r, c = block.shape
    eye = jnp.eye(p, dtype=block.dtype)
    return (eye[:, None, :, None] * block[None, :, None, :]).reshape(p * r, p * c)


@functools.partial(jax.jit, static_argnames=("tm",))
def gate_forward(h, message, g_weight, g_bias, w_weight, w_bias, *, tm=2048):
    """h: (B, N, in), message: (B, N, edge). Returns (B, N, out)."""
    B, N, in_f = h.shape
    edge_f = message.shape[-1]
    out_f = w_weight.shape[0]
    assert in_f == out_f, "Gate requires in_feature == out_feature"

    # Pack `p` logical rows per lane-row so every last dim is a multiple of 128.
    p = math.lcm(128 // math.gcd(128, in_f), 128 // math.gcd(128, edge_f))

    M = B * N
    pad = (-M) % p
    h2 = h.reshape(M, in_f)
    m2 = message.reshape(M, edge_f)
    if pad:
        h2 = jnp.pad(h2, ((0, pad), (0, 0)))
        m2 = jnp.pad(m2, ((0, pad), (0, 0)))
    Mp = (M + pad) // p
    P = p * out_f            # packed output width  (multiple of 128)
    Pm = p * edge_f          # packed message width (multiple of 128)

    h_packed = h2.reshape(Mp, p * in_f)
    m_packed = m2.reshape(Mp, Pm)

    # ---- weight prep (plain JAX glue).  PyTorch Linear: y = x @ W.T + b. ----
    f32 = jnp.float32
    gwh = g_weight[:, :in_f].T.astype(f32)                  # (in_f, 1)
    gwm = g_weight[:, in_f:].T.astype(f32)                  # (edge_f, 1)
    gh_bd = _block_diag(jnp.broadcast_to(gwh, (in_f, out_f)), p)     # (p*in_f, P)
    gm_bd = _block_diag(jnp.broadcast_to(gwm, (edge_f, out_f)), p)   # (Pm, P)
    w_bd = _block_diag(w_weight.T.astype(f32), p)                    # (Pm, P)
    wm_fused = jnp.concatenate([gm_bd, w_bd], axis=1)                # (Pm, 2P)
    bias_fused = jnp.concatenate(
        [jnp.broadcast_to(g_bias.astype(f32), (P,)), jnp.tile(w_bias.astype(f32), p)]
    ).reshape(1, 2 * P)

    # ---- row tile: large (amortize ~600-cycle/step overhead), multiple of 8,
    # and keep >=2 grid steps when the problem is big enough (v7x megacore). ----
    if Mp >= 16:
        tm_eff = min(tm, -(-Mp // 2))       # at most half the rows -> >= 2 steps
        tm_eff = -(-tm_eff // 8) * 8        # round up to a multiple of 8
    else:
        tm_eff = Mp                         # tiny problem: single full block
    grid = (pl.cdiv(Mp, tm_eff),)
    # VMEM per step (f32): ~3 * tm_eff * max(P, 2P skipped) * 4 B * 2 buffers
    # -> ~6 MiB at tm=2048, P=128: well under the default scoped VMEM limit.

    out = pl.pallas_call(
        gate_kernel,
        out_shape=jax.ShapeDtypeStruct((Mp, P), h.dtype),
        grid_spec=pltpu.PrefetchScalarGridSpec(
            num_scalar_prefetch=0,
            grid=grid,
            in_specs=[
                pl.BlockSpec((tm_eff, p * in_f), lambda i: (i, 0)),   # packed h rows
                pl.BlockSpec((tm_eff, Pm), lambda i: (i, 0)),         # packed message rows
                pl.BlockSpec((p * in_f, P), lambda i: (0, 0)),        # gate weight (h part)
                pl.BlockSpec((Pm, 2 * P), lambda i: (0, 0)),          # fused [gate_msg | W]
                pl.BlockSpec((1, 2 * P), lambda i: (0, 0)),           # fused biases
            ],
            out_specs=pl.BlockSpec((tm_eff, P), lambda i: (i, 0)),
        ),
        compiler_params=pltpu.CompilerParams(
            dimension_semantics=("parallel",),
        ),
    )(h_packed, m_packed, gh_bd, wm_fused, bias_fused)

    out = out.reshape(Mp * p, out_f)[:M]
    return out.reshape(B, N, out_f)


def gate_reference(h, message, g_weight, g_bias, w_weight, w_bias):
    """Plain-JAX reference mirroring the PyTorch forward."""
    cat = jnp.concatenate([h, message], axis=-1)
    coeff = jax.nn.sigmoid(cat @ g_weight.T + g_bias)          # (B, N, 1)
    wmsg = message @ w_weight.T + w_bias                       # (B, N, out)
    retval = coeff * h + (1.0 - coeff) * wmsg
    return retval * jax.nn.sigmoid(retval)                     # silu


if __name__ == "__main__":
    # Small, module-consistent shapes: batch=2, nodes=8, in=out=32, edge=32.
    B, N = 2, 8
    in_feature = out_feature = 32
    edge_feature = 32

    key = jax.random.PRNGKey(0)
    k_h, k_m, k_gw, k_gb, k_ww, k_wb = jax.random.split(key, 6)

    h = jax.random.normal(k_h, (B, N, in_feature), dtype=jnp.float32)
    message = jax.random.normal(k_m, (B, N, edge_feature), dtype=jnp.float32)

    # Deterministic synthetic parameters (shapes match nn.Linear in __init__).
    g_weight = 0.1 * jax.random.normal(k_gw, (1, in_feature + edge_feature), jnp.float32)
    g_bias = 0.1 * jax.random.normal(k_gb, (1,), jnp.float32)
    w_weight = 0.1 * jax.random.normal(k_ww, (out_feature, edge_feature), jnp.float32)
    w_bias = 0.1 * jax.random.normal(k_wb, (out_feature,), jnp.float32)

    out = gate_forward(h, message, g_weight, g_bias, w_weight, w_bias)
    out = jax.block_until_ready(out)

    ref = gate_reference(h, message, g_weight, g_bias, w_weight, w_bias)
    assert out.shape == (B, N, out_feature)
    assert jnp.allclose(out, ref, atol=1e-5, rtol=1e-5), "mismatch vs reference"

    print("KERNEL_OK")
</pallas_src>

<mosaic_0001>
module attributes {stable_mosaic.version = 11 : i64} {
  func.func @gate_kernel(%arg0: i32, %arg1: memref<4x128xf32, #tpu.memory_space<vmem>>, %arg2: memref<4x128xf32, #tpu.memory_space<vmem>>, %arg3: memref<128x128xf32, #tpu.memory_space<vmem>>, %arg4: memref<128x256xf32, #tpu.memory_space<vmem>>, %arg5: memref<1x256xf32, #tpu.memory_space<vmem>>, %arg6: memref<4x128xf32, #tpu.memory_space<vmem>>) attributes {dimension_semantics = [#tpu.dimension_semantics<parallel>], iteration_bounds = array<i64: 1>, scalar_prefetch = 0 : i64, scratch_operands = 0 : i64, tpu.core_type = #tpu.core_type<tc>, window_params = [{transform_indices = @transform_0, window_bounds = array<i64: 4, 128>}, {transform_indices = @transform_1, window_bounds = array<i64: 4, 128>}, {pipeline_mode = #tpu.pipeline_mode<synchronous>, transform_indices = @transform_2, window_bounds = array<i64: 128, 128>}, {pipeline_mode = #tpu.pipeline_mode<synchronous>, transform_indices = @transform_3, window_bounds = array<i64: 128, 256>}, {pipeline_mode = #tpu.pipeline_mode<synchronous>, transform_indices = @transform_4, window_bounds = array<i64: 1, 256>}, {transform_indices = @transform_5, window_bounds = array<i64: 4, 128>}]} {
    %c0 = arith.constant 0 : index
    %c0_0 = arith.constant 0 : index
    %0 = vector.load %arg1[%c0, %c0_0] : memref<4x128xf32, #tpu.memory_space<vmem>>, vector<4x128xf32>
    %c0_1 = arith.constant 0 : index
    %c0_2 = arith.constant 0 : index
    %1 = vector.load %arg2[%c0_1, %c0_2] : memref<4x128xf32, #tpu.memory_space<vmem>>, vector<4x128xf32>
    %c0_3 = arith.constant 0 : index
    %c0_4 = arith.constant 0 : index
    %2 = vector.load %arg4[%c0_3, %c0_4] : memref<128x256xf32, #tpu.memory_space<vmem>>, vector<128x256xf32>
    %cst = arith.constant dense<0.000000e+00> : vector<4x256xf32>
    %3 = tpu.matmul %1, %2, %cst {dimension_numbers = #tpu.dot_dimension_numbers<[1], [0], [0], [1], [0, 0, 1, 1], [], []>} : vector<4x128xf32>, vector<128x256xf32>, vector<4x256xf32> -> vector<4x256xf32>
    %c0_5 = arith.constant 0 : index
    %c0_6 = arith.constant 0 : index
    %4 = vector.load %arg5[%c0_5, %c0_6] : memref<1x256xf32, #tpu.memory_space<vmem>>, vector<1x256xf32>
    %5 = vector.broadcast %4 : vector<1x256xf32> to vector<4x256xf32>
    %6 = arith.addf %3, %5 : vector<4x256xf32>
    %c0_7 = arith.constant 0 : index
    %c0_8 = arith.constant 0 : index
    %7 = vector.load %arg1[%c0_7, %c0_8] : memref<4x128xf32, #tpu.memory_space<vmem>>, vector<4x128xf32>
    %c0_9 = arith.constant 0 : index
    %c0_10 = arith.constant 0 : index
    %8 = vector.load %arg3[%c0_9, %c0_10] : memref<128x128xf32, #tpu.memory_space<vmem>>, vector<128x128xf32>
    %cst_11 = arith.constant dense<0.000000e+00> : vector<4x128xf32>
    %9 = tpu.matmul %7, %8, %cst_11 {dimension_numbers = #tpu.dot_dimension_numbers<[1], [0], [0], [1], [0, 0, 1, 1], [], []>} : vector<4x128xf32>, vector<128x128xf32>, vector<4x128xf32> -> vector<4x128xf32>
    %10 = vector.extract_strided_slice %6 {offsets = [0, 0], sizes = [4, 128], strides = [1, 1]} : vector<4x256xf32> to vector<4x128xf32>
    %11 = arith.addf %9, %10 : vector<4x128xf32>
    %12 = arith.negf %11 : vector<4x128xf32>
    %13 = math.exp %12 : vector<4x128xf32>
    %cst_12 = arith.constant 1.000000e+00 : f32
    %14 = vector.broadcast %cst_12 : f32 to vector<4x128xf32>
    %15 = arith.addf %14, %13 : vector<4x128xf32>
    %16 = arith.divf %14, %15 : vector<4x128xf32>
    %17 = vector.extract_strided_slice %6 {offsets = [0, 128], sizes = [4, 128], strides = [1, 1]} : vector<4x256xf32> to vector<4x128xf32>
    %18 = arith.mulf %16, %0 : vector<4x128xf32>
    %cst_13 = arith.constant 1.000000e+00 : f32
    %19 = vector.broadcast %cst_13 : f32 to vector<4x128xf32>
    %20 = arith.subf %19, %16 : vector<4x128xf32>
    %21 = arith.mulf %20, %17 : vector<4x128xf32>
    %22 = arith.addf %18, %21 : vector<4x128xf32>
    %23 = arith.negf %22 : vector<4x128xf32>
    %24 = math.exp %23 : vector<4x128xf32>
    %cst_14 = arith.constant 1.000000e+00 : f32
    %25 = vector.broadcast %cst_14 : f32 to vector<4x128xf32>
    %26 = arith.addf %25, %24 : vector<4x128xf32>
    %27 = arith.divf %25, %26 : vector<4x128xf32>
    %28 = arith.mulf %22, %27 : vector<4x128xf32>
    %c0_15 = arith.constant 0 : index
    %c0_16 = arith.constant 0 : index
    %29 = vector.load %arg6[%c0_15, %c0_16] : memref<4x128xf32, #tpu.memory_space<vmem>>, vector<4x128xf32>
    tpu.vector_store %arg6[%c0_15, %c0_16], %28 {strides = array<i32>} : memref<4x128xf32, #tpu.memory_space<vmem>>, vector<4x128xf32>,
    return
  }
  func.func @transform_0(%arg0: i32) -> (i32, i32) {
    %c0_i32 = arith.constant 0 : i32
    %c0_i32_0 = arith.constant 0 : i32
    return %arg0, %c0_i32 : i32, i32
  }
  func.func @transform_1(%arg0: i32) -> (i32, i32) {
    %c0_i32 = arith.constant 0 : i32
    %c0_i32_0 = arith.constant 0 : i32
    return %arg0, %c0_i32 : i32, i32
  }
  func.func @transform_2(%arg0: i32) -> (i32, i32) {
    %c0_i32 = arith.constant 0 : i32
    %c0_i32_0 = arith.constant 0 : i32
    %c0_i32_1 = arith.constant 0 : i32
    return %c0_i32, %c0_i32_0 : i32, i32
  }
  func.func @transform_3(%arg0: i32) -> (i32, i32) {
    %c0_i32 = arith.constant 0 : i32
    %c0_i32_0 = arith.constant 0 : i32
    %c0_i32_1 = arith.constant 0 : i32
    return %c0_i32, %c0_i32_0 : i32, i32
  }
  func.func @transform_4(%arg0: i32) -> (i32, i32) {
    %c0_i32 = arith.constant 0 : i32
    %c0_i32_0 = arith.constant 0 : i32
    %c0_i32_1 = arith.constant 0 : i32
    return %c0_i32, %c0_i32_0 : i32, i32
  }
  func.func @transform_5(%arg0: i32) -> (i32, i32) {
    %c0_i32 = arith.constant 0 : i32
    %c0_i32_0 = arith.constant 0 : i32
    return %arg0, %c0_i32 : i32, i32
  }
}

</mosaic_0001>

<bundles_post_ra>
// kernel: gate_forward.1
= control target key start
LH: loop header
LB: loop body
LE: loop exit
PB: predicated region body
PF: predicated region fallthrough
CT: control target
= control target key end

     0   :  { %v309_v1 = vmov 0.0   ;;  %vm310_vm0 = vmmov 0   ;;  %v56_v51 = vlaneseq  ;;  %s515_s3 = inlined_call_operand.vmem [shape: f32[128,256], index: 3, kind: input, shape index: {}]   ;;  %s516_s2 = inlined_call_operand.vmem [shape: f32[128,128], index: 2, kind: input, shape index: {}]   ;;  %s517_s1 = inlined_call_operand.vmem [shape: f32[4,128], index: 1, kind: input, shape index: {}]   ;;  %s518_s0 = inlined_call_operand.vmem [shape: f32[4,128], index: 0, kind: input, shape index: {}]   ;;  %s519_s4 = inlined_call_operand.vmem [shape: f32[1,256], index: 4, kind: input, shape index: {}]   ;;  %s520_s5 = inlined_call_operand.vmem [shape: f32[4,128], index: 5, kind: output, shape index: {}]  }
   0x1   :  { %v53_v0 = vld [vmem:[%s515_s3 + $0xf8] sm:$0xff]  ;;  %264 = vmatprep.subr.mxu1 %v309_v1  ;;  %v52_v2 = vld [vmem:[%s515_s3 + $0xf0] sm:$0xff]  ;;  %130 = vmatprep.mubr.f32.mxu0 %v309_v1  ;;  %v51_v4 = vld [vmem:[%s515_s3 + $0xe8] sm:$0xff] }
   0x2   :  { %v152_v3 = vld [vmem:[%s516_s2 + $0x78] sm:$0xff]  ;;  %66 = vmatprep.subr.mxu0 %v53_v0  ;;  %v50_v5 = vld [vmem:[%s515_s3 + $0xe0] sm:$0xff]  ;;  %v151_v6 = vld [vmem:[%s516_s2 + $0x70] sm:$0xff]  ;;  %296 = vmatprep.mubr.msk.f32.mxu1 %vm310_vm0, %v309_v1  ;;  %v57_v52 = vshrl.u32 %v56_v51, 7 }
   0x3   :  { %265 = vmatpush3.msra.mxu1 %v152_v3  ;;  %67 = vmatpush1.msra.mxu0 %v52_v2  ;;  %v49_v7 = vld [vmem:[%s515_s3 + $0xd8] sm:$0xff]  ;;  %v150_v8 = vld [vmem:[%s516_s2 + $0x68] sm:$0xff]  ;;  %v48_v9 = vld [vmem:[%s515_s3 + $0xd0] sm:$0xff] }
   0x4   :  { %266 = vmatprep.subr.mxu1 %v309_v1  ;;  %68 = vmatprep.subr.mxu0 %v51_v4  ;;  %v47_v10 = vld [vmem:[%s515_s3 + $0xc8] sm:$0xff]  ;;  %v149_v11 = vld [vmem:[%s516_s2 + $0x60] sm:$0xff]  ;;  %v45_v13 = vld [vmem:[%s515_s3 + $0xb8] sm:$0xff]  ;;  %v58_v53 = vsub.s32 0, %v57_v52  ;;  %v62_v0 = vsub.s32 1, %v57_v52 }
   0x5   :  { %267 = vmatpush3.msra.mxu1 %v151_v6  ;;  %69 = vmatpush1.msra.mxu0 %v50_v5  ;;  %v46_v12 = vld [vmem:[%s515_s3 + $0xc0] sm:$0xff]  ;;  %v148_v14 = vld [vmem:[%s516_s2 + $0x58] sm:$0xff]  ;;  %v44_v15 = vld [vmem:[%s515_s3 + $0xb0] sm:$0xff] }
   0x6   :  { %268 = vmatprep.subr.mxu1 %v309_v1  ;;  %70 = vmatprep.subr.mxu0 %v49_v7  ;;  %v43_v16 = vld [vmem:[%s515_s3 + $0xa8] sm:$0xff]  ;;  %v147_v17 = vld [vmem:[%s516_s2 + $0x50] sm:$0xff]  ;;  %v42_v18 = vld [vmem:[%s515_s3 + $0xa0] sm:$0xff] }
   0x7   :  { %269 = vmatpush3.msra.mxu1 %v150_v8  ;;  %71 = vmatpush1.msra.mxu0 %v48_v9  ;;  %v41_v19 = vld [vmem:[%s515_s3 + $0x98] sm:$0xff]  ;;  %v146_v20 = vld [vmem:[%s516_s2 + $0x48] sm:$0xff]  ;;  %v40_v21 = vld [vmem:[%s515_s3 + $0x90] sm:$0xff] }
   0x8   :  { %270 = vmatprep.subr.mxu1 %v309_v1  ;;  %72 = vmatprep.subr.mxu0 %v47_v10  ;;  %v39_v22 = vld [vmem:[%s515_s3 + $0x88] sm:$0xff]  ;;  %v145_v23 = vld [vmem:[%s516_s2 + $0x40] sm:$0xff]  ;;  %v37_v25 = vld [vmem:[%s515_s3 + $0x78] sm:$0xff] }
   0x9   :  { %271 = vmatpush3.msra.mxu1 %v149_v11  ;;  %73 = vmatpush1.msra.mxu0 %v46_v12  ;;  %v38_v24 = vld [vmem:[%s515_s3 + $0x80] sm:$0xff]  ;;  %v144_v26 = vld [vmem:[%s516_s2 + $0x38] sm:$0xff]  ;;  %v36_v27 = vld [vmem:[%s515_s3 + $0x70] sm:$0xff] }
   0xa   :  { %272 = vmatprep.subr.mxu1 %v309_v1  ;;  %74 = vmatprep.subr.mxu0 %v45_v13  ;;  %v35_v28 = vld [vmem:[%s515_s3 + $0x68] sm:$0xff]  ;;  %v143_v29 = vld [vmem:[%s516_s2 + $0x30] sm:$0xff]  ;;  %v34_v30 = vld [vmem:[%s515_s3 + $0x60] sm:$0xff] }
   0xb   :  { %273 = vmatpush3.msra.mxu1 %v148_v14  ;;  %75 = vmatpush1.msra.mxu0 %v44_v15  ;;  %v33_v31 = vld [vmem:[%s515_s3 + $0x58] sm:$0xff]  ;;  %v142_v32 = vld [vmem:[%s516_s2 + $0x28] sm:$0xff]  ;;  %v32_v33 = vld [vmem:[%s515_s3 + $0x50] sm:$0xff] }
   0xc   :  { %274 = vmatprep.subr.mxu1 %v309_v1  ;;  %76 = vmatprep.subr.mxu0 %v43_v16  ;;  %v31_v34 = vld [vmem:[%s515_s3 + $0x48] sm:$0xff]  ;;  %v141_v35 = vld [vmem:[%s516_s2 + $0x20] sm:$0xff]  ;;  %v29_v37 = vld [vmem:[%s515_s3 + $0x38] sm:$0xff] }
   0xd   :  { %275 = vmatpush3.msra.mxu1 %v147_v17  ;;  %77 = vmatpush1.msra.mxu0 %v42_v18  ;;  %v30_v36 = vld [vmem:[%s515_s3 + $0x40] sm:$0xff]  ;;  %v140_v38 = vld [vmem:[%s516_s2 + $0x18] sm:$0xff]  ;;  %v28_v39 = vld [vmem:[%s515_s3 + $0x30] sm:$0xff] }
   0xe   :  { %276 = vmatprep.subr.mxu1 %v309_v1  ;;  %78 = vmatprep.subr.mxu0 %v41_v19  ;;  %v27_v40 = vld [vmem:[%s515_s3 + $0x28] sm:$0xff]  ;;  %v139_v41 = vld [vmem:[%s516_s2 + $0x10] sm:$0xff]  ;;  %v26_v42 = vld [vmem:[%s515_s3 + $0x20] sm:$0xff] }
   0xf   :  { %277 = vmatpush3.msra.mxu1 %v146_v20  ;;  %79 = vmatpush1.msra.mxu0 %v40_v21  ;;  %v25_v43 = vld [vmem:[%s515_s3 + $0x18] sm:$0xff]  ;;  %v138_v44 = vld [vmem:[%s516_s2 + $0x8] sm:$0xff]  ;;  %v24_v45 = vld [vmem:[%s515_s3 + $0x10] sm:$0xff] }
  0x10   :  { %278 = vmatprep.subr.mxu1 %v309_v1  ;;  %80 = vmatprep.subr.mxu0 %v39_v22  ;;  %v23_v46 = vld [vmem:[%s515_s3 + $0x8] sm:$0xff]  ;;  %v137_v47 = vld [vmem:[%s516_s2] sm:$0xff] }
  0x11   :  { %279 = vmatpush3.msra.mxu1 %v145_v23  ;;  %81 = vmatpush1.msra.mxu0 %v38_v24  ;;  %v22_v48 = vld [vmem:[%s515_s3] sm:$0xff] }
  0x12   :  { %280 = vmatprep.subr.mxu1 %v309_v1  ;;  %82 = vmatprep.subr.mxu0 %v37_v25  ;;  %v21_v49 = vld [vmem:[%s517_s1] sm:$0xf] }
  0x13   :  { %281 = vmatpush3.msra.mxu1 %v144_v26  ;;  %83 = vmatpush1.msra.mxu0 %v36_v27  ;;  %v20_v50 = vld [vmem:[%s518_s0] sm:$0xf] }
  0x14   :  { %282 = vmatprep.subr.mxu1 %v309_v1  ;;  %84 = vmatprep.subr.mxu0 %v35_v28  ;;  %v54_v54 = vld [vmem:[%s519_s4] sm:$0x3] }
  0x15   :  { %283 = vmatpush3.msra.mxu1 %v143_v29  ;;  %85 = vmatpush1.msra.mxu0 %v34_v30  ;;  %v59_v55 = vrot.slane %v54_v54, %v58_v53 }
  0x16   :  { %284 = vmatprep.subr.mxu1 %v309_v1  ;;  %86 = vmatprep.subr.mxu0 %v33_v31 }
  0x17   :  { %285 = vmatpush3.msra.mxu1 %v142_v32  ;;  %87 = vmatpush1.msra.mxu0 %v32_v33 }
  0x18   :  { %286 = vmatprep.subr.mxu1 %v309_v1  ;;  %88 = vmatprep.subr.mxu0 %v31_v34 }
  0x19   :  { %287 = vmatpush3.msra.mxu1 %v141_v35  ;;  %89 = vmatpush1.msra.mxu0 %v30_v36 }
  0x1a   :  { %288 = vmatprep.subr.mxu1 %v309_v1  ;;  %90 = vmatprep.subr.mxu0 %v29_v37 }
  0x1b   :  { %289 = vmatpush3.msra.mxu1 %v140_v38  ;;  %91 = vmatpush1.msra.mxu0 %v28_v39 }
  0x1c   :  { %290 = vmatprep.subr.mxu1 %v309_v1  ;;  %92 = vmatprep.subr.mxu0 %v27_v40 }
  0x1d   :  { %291 = vmatpush3.msra.mxu1 %v139_v41  ;;  %93 = vmatpush1.msra.mxu0 %v26_v42 }
  0x1e   :  { %292 = vmatprep.subr.mxu1 %v309_v1  ;;  %94 = vmatprep.subr.mxu0 %v25_v43 }
  0x1f   :  { %293 = vmatpush3.msra.mxu1 %v138_v44  ;;  %95 = vmatpush1.msra.mxu0 %v24_v45 }
  0x20   :  { %294 = vmatprep.subr.mxu1 %v309_v1  ;;  %96 = vmatprep.subr.mxu0 %v23_v46  ;;  %v63_v1 = vrot.slane %v54_v54, %v62_v0 }
  0x21   :  { %295 = vmatpush3.msra.mxu1 %v137_v47  ;;  %97 = vmatpush1.msra.mxu0 %v22_v48 }
  0x22   :  { %131 = vmatmul.mubr.f32.vlgmr.msra.gmra.mxu0 %v21_v49  ;;  %297 = vmatmul.mubr.f32.vlgmr.msra.gmra.mxu1 %v20_v50 }
  0xe2   :  { %v132_v56 = vpop.f32.mrf.mxu0  ;;  %v219_v57 = vpop.f32.mrf.mxu1 }
  0xe3   :  { %v133_v58 = vadd.f32 %v132_v56, %v59_v55 }
  0xe4   :  { %v298_v59 = vpop.f32.mrf.mxu1  ;;  %v134_v2 = vpop.f32.mrf.mxu0 }
  0xe5   :  { %v220_v60 = vadd.f32 %v219_v57, %v133_v58  ;;  %v135_v4 = vadd.f32 %v134_v2, %v63_v1 }
  0xe7   :  { %v245_v61 = vmul.f32 -1.442695, %v220_v60 }
  0xe9   :  { %301 = vpow2.f32 %v245_v61 }
  0xf6   :  { %v302_v62 = vpop.eup %301 }
  0xf7   :  { %v226_v63 = vadd.f32 1.0, %v302_v62 }
  0xf9   :  { %303 = vrcp.f32 %v226_v63 }
 0x106   :  { %v304_v3 = vpop.eup %303 }
 0x107   :  { %v230_v5 = vsub.f32 1.0, %v304_v3  ;;  %v229_v6 = vmul.f32 %v304_v3, %v20_v50 }
 0x109   :  { %v231_v7 = vmul.f32 %v230_v5, %v135_v4 }
 0x10b   :  { %v232_v8 = vadd.f32 %v231_v7, %v229_v6 }
 0x10d   :  { %v246_v9 = vmul.f32 -1.442695, %v232_v8 }
 0x10f   :  { %305 = vpow2.f32 %v246_v9 }
 0x11c   :  { %v306_v10 = vpop.eup %305 }
 0x11d   :  { %v236_v11 = vadd.f32 1.0, %v306_v10 }
 0x11f   :  { %307 = vrcp.f32 %v236_v11 }
 0x12c   :  { %v308_v12 = vpop.eup %307 }
 0x12d   :  { %v239_v13 = vmul.f32 %v308_v12, %v232_v8 }
 0x12f   :  { %240 = vst [vmem:[%s520_s5] sm:$0xf] %v239_v13 }

</bundles_post_ra>
